<compile_context>
chip_gen: v7x
topology: tpu7x:2x2x1
jax: 0.10.0
libtpu: 0.0.40
codegen_flags: <defaults>
</compile_context>

<pallas_src>
import functools

import jax
import jax.numpy as jnp
from jax.experimental import pallas as pl
from jax.experimental.pallas import tpu as pltpu


def _round_up(x, m):
    return ((x + m - 1) // m) * m


def _mlp_kernel(s_ref, a_ref, w1s_ref, w1a_ref, w23_ref, b_ref, out_ref,
                *, hidden_dim, feature_dim):
    wdtype = w1s_ref.dtype
    s = s_ref[...].astype(wdtype)
    a = a_ref[...].astype(wdtype)

    # Static slices of the packed operands (free / cheap VMEM reads).
    w2 = w23_ref[:, :hidden_dim]
    w3 = w23_ref[:, hidden_dim:hidden_dim + feature_dim]
    b1 = b_ref[0:1, :hidden_dim]
    b2 = b_ref[1:2, :hidden_dim]
    b3 = b_ref[2:3, :feature_dim]

    # concat(state, action) @ W1  ==  state @ W1[:sd] + action @ W1[sd:]
    h1 = (jnp.dot(s, w1s_ref[...], preferred_element_type=jnp.float32)
          + jnp.dot(a, w1a_ref[...], preferred_element_type=jnp.float32)
          + b1)
    h1 = jnp.maximum(h1, 0.0)                       # f32 elementwise (v5e-safe)
    h2 = jnp.dot(h1.astype(wdtype), w2,
                 preferred_element_type=jnp.float32) + b2
    h2 = jnp.maximum(h2, 0.0)
    logit = jnp.dot(h2.astype(wdtype), w3,
                    preferred_element_type=jnp.float32) + b3
    out_ref[...] = logit.astype(out_ref.dtype)


def _pick_tile(batch, tile_m):
    """Rows per grid step.

    Small batch -> one full-extent block (no masked rows, grid=(1,)).
    batch > 64 -> at least 2 blocks so both v7x TensorCores get work, capped
    at tile_m rows per step (512 default; per-row VMEM footprint is ~3 KB so
    even 512 rows is ~1.6 MB, far below any generation's VMEM)."""
    n_target = 1 if batch <= 64 else 2
    tile = min(tile_m, _round_up(pl.cdiv(batch, n_target), 8))
    if tile >= batch:
        tile = batch            # full-extent block: no padded rows at all
    return tile


def discrete_feature_forward(state, action, params, *, tile_m=512,
                             out_dtype=jnp.float32):
    """Pallas implementation of DiscreteFeature.forward -> logits (B, feat_dim).

    out_dtype=jnp.bfloat16 halves the output HBM write (useful at large batch
    on v5e/v6e); default f32 for closest parity with the PyTorch module."""
    w1_s, w1_a, w23, b_stack = params
    batch, state_dim = state.shape
    action_dim = action.shape[-1]
    hidden_dim = w1_s.shape[1]
    feature_dim = w23.shape[1] - hidden_dim

    tile = _pick_tile(batch, tile_m)
    grid = (pl.cdiv(batch, tile),)

    kernel = functools.partial(_mlp_kernel, hidden_dim=hidden_dim,
                               feature_dim=feature_dim)

    operands = (state, action, w1_s, w1_a, w23, b_stack)

    flops = 2 * batch * ((state_dim + action_dim) * hidden_dim
                         + hidden_dim * hidden_dim
                         + hidden_dim * feature_dim)
    bytes_accessed = (sum(int(o.size) * o.dtype.itemsize for o in operands)
                      + batch * feature_dim * jnp.dtype(out_dtype).itemsize)
    cost = pl.CostEstimate(flops=flops, transcendentals=0,
                           bytes_accessed=bytes_accessed)

    def batch_spec(d):
        return pl.BlockSpec((tile, d), lambda i: (i, 0))

    def run(single_buffer_weights):
        if single_buffer_weights:
            # Constant index_map => one fetch; a single VMEM buffer skips the
            # useless second copy and per-step prefetch bookkeeping.
            def resident_spec(a):
                return pl.BlockSpec(a.shape, lambda i: (0, 0),
                                    pipeline_mode=pl.Buffered(1))
        else:
            def resident_spec(a):
                return pl.BlockSpec(a.shape, lambda i: (0, 0))

        return pl.pallas_call(
            kernel,
            out_shape=jax.ShapeDtypeStruct((batch, feature_dim), out_dtype),
            grid=grid,
            in_specs=[batch_spec(state_dim), batch_spec(action_dim),
                      resident_spec(w1_s), resident_spec(w1_a),
                      resident_spec(w23), resident_spec(b_stack)],
            out_specs=pl.BlockSpec((tile, feature_dim), lambda i: (i, 0)),
            compiler_params=pltpu.CompilerParams(
                dimension_semantics=("parallel",)),
            cost_estimate=cost,
        )(*operands)

    try:
        return run(single_buffer_weights=True)
    except Exception:
        # BlockSpec.pipeline_mode / pl.Buffered(1) unsupported on this JAX:
        # fall back to default double-buffered resident weights (same math,
        # ~270 KB extra VMEM, still nowhere near the limit).
        return run(single_buffer_weights=False)


def init_params(key, state_dim, action_dim, category_size=16, class_size=16,
                hidden_dim=256, weight_dtype=jnp.bfloat16):
    """PyTorch-nn.Linear-style init (U(-1/sqrt(fan_in), ..)); weights stored
    (in, out).  One-time packing:
      * w1 split into w1[:state_dim] / w1[state_dim:]   (removes x = concat),
      * w2 | w3 concatenated into one (hidden, hidden+feature) bf16 slab,
      * b1/b2/b3 stacked into one (3, max(hidden, feature)) f32 slab."""
    feature_dim = category_size * class_size
    in_dim = state_dim + action_dim
    dims = [(in_dim, hidden_dim), (hidden_dim, hidden_dim),
            (hidden_dim, feature_dim)]
    raw = []
    for fan_in, fan_out in dims:
        key, kw, kb = jax.random.split(key, 3)
        bound = 1.0 / jnp.sqrt(fan_in)
        w = jax.random.uniform(kw, (fan_in, fan_out), jnp.float32, -bound, bound)
        b = jax.random.uniform(kb, (1, fan_out), jnp.float32, -bound, bound)
        raw += [w, b]
    w1, b1, w2, b2, w3, b3 = raw

    w1_s = w1[:state_dim].astype(weight_dtype)
    w1_a = w1[state_dim:].astype(weight_dtype)
    w23 = jnp.concatenate([w2, w3], axis=1).astype(weight_dtype)

    bw = max(hidden_dim, feature_dim)
    pad = lambda b: jnp.pad(b, ((0, 0), (0, bw - b.shape[1])))
    b_stack = jnp.concatenate([pad(b1), pad(b2), pad(b3)], axis=0)  # (3,bw) f32
    return (w1_s, w1_a, w23, b_stack)


def reference_forward(state, action, params):
    """Same-precision pure-JAX reference (bf16 weights, f32 accumulation)."""
    w1_s, w1_a, w23, b_stack = params
    hidden_dim = w1_s.shape[1]
    feature_dim = w23.shape[1] - hidden_dim
    w2 = w23[:, :hidden_dim]
    w3 = w23[:, hidden_dim:]
    b1 = b_stack[0:1, :hidden_dim]
    b2 = b_stack[1:2, :hidden_dim]
    b3 = b_stack[2:3, :feature_dim]
    wdtype = w1_s.dtype
    s = state.astype(wdtype)
    a = action.astype(wdtype)
    h1 = jnp.maximum(jnp.dot(s, w1_s, preferred_element_type=jnp.float32)
                     + jnp.dot(a, w1_a, preferred_element_type=jnp.float32)
                     + b1, 0.0)
    h2 = jnp.maximum(jnp.dot(h1.astype(wdtype), w2,
                             preferred_element_type=jnp.float32) + b2, 0.0)
    return jnp.dot(h2.astype(wdtype), w3,
                   preferred_element_type=jnp.float32) + b3


if __name__ == "__main__":
    key = jax.random.PRNGKey(0)
    state_dim, action_dim = 17, 6
    category_size, class_size, hidden_dim = 16, 16, 256

    k_params, k_s, k_a = jax.random.split(key, 3)
    params = init_params(k_params, state_dim, action_dim,
                         category_size, class_size, hidden_dim)

    # Small inference-style case (B=4 -> single full-extent block, grid=(1,)).
    batch = 4
    state = jax.random.normal(k_s, (batch, state_dim), jnp.float32)
    action = jax.random.normal(k_a, (batch, action_dim), jnp.float32)
    logit = discrete_feature_forward(state, action, params)
    jax.block_until_ready(logit)
    ref = reference_forward(state, action, params)
    assert logit.shape == (batch, category_size * class_size)
    assert jnp.allclose(logit, ref, atol=2e-2, rtol=2e-2)

    # Non-multiple batch > 64 -> 2-step grid (feeds both v7x TensorCores) with
    # a masked ragged final output block; no wrapper-side pad or slice.
    k_s2, k_a2 = jax.random.split(k_s)
    batch2 = 300
    state2 = jax.random.normal(k_s2, (batch2, state_dim), jnp.float32)
    action2 = jax.random.normal(k_a2, (batch2, action_dim), jnp.float32)
    logit2 = discrete_feature_forward(state2, action2, params)
    jax.block_until_ready(logit2)
    ref2 = reference_forward(state2, action2, params)
    assert logit2.shape == (batch2, category_size * class_size)
    assert jnp.allclose(logit2, ref2, atol=2e-2, rtol=2e-2)

    # TODO(synk): get_dist / get_feature are torch.distributions
    # (OneHotCategoricalStraightThrough) wrappers around these logits
    # (reshape to (B, category, class) + softmax); the kernel hot path is
    # forward(), the distribution lives outside the kernel.
    print("KERNEL_OK")
</pallas_src>

<mosaic_0001>
module attributes {stable_mosaic.version = 11 : i64} {
  func.func @_mlp_kernel(%arg0: i32, %arg1: memref<4x17xf32, #tpu.memory_space<vmem>>, %arg2: memref<4x6xf32, #tpu.memory_space<vmem>>, %arg3: memref<17x256xbf16, #tpu.memory_space<vmem>>, %arg4: memref<6x256xbf16, #tpu.memory_space<vmem>>, %arg5: memref<256x512xbf16, #tpu.memory_space<vmem>>, %arg6: memref<3x256xf32, #tpu.memory_space<vmem>>, %arg7: memref<4x256xf32, #tpu.memory_space<vmem>>) attributes {dimension_semantics = [#tpu.dimension_semantics<parallel>], iteration_bounds = array<i64: 1>, scalar_prefetch = 0 : i64, scratch_operands = 0 : i64, tpu.core_type = #tpu.core_type<tc>, window_params = [{transform_indices = @transform_0, window_bounds = array<i64: 4, 17>}, {transform_indices = @transform_1, window_bounds = array<i64: 4, 6>}, {pipeline_mode = #tpu.pipeline_mode<synchronous>, transform_indices = @transform_2, window_bounds = array<i64: 17, 256>}, {pipeline_mode = #tpu.pipeline_mode<synchronous>, transform_indices = @transform_3, window_bounds = array<i64: 6, 256>}, {pipeline_mode = #tpu.pipeline_mode<synchronous>, transform_indices = @transform_4, window_bounds = array<i64: 256, 512>}, {pipeline_mode = #tpu.pipeline_mode<synchronous>, transform_indices = @transform_5, window_bounds = array<i64: 3, 256>}, {transform_indices = @transform_6, window_bounds = array<i64: 4, 256>}]} {
    %c0 = arith.constant 0 : index
    %c0_0 = arith.constant 0 : index
    %0 = vector.load %arg1[%c0, %c0_0] : memref<4x17xf32, #tpu.memory_space<vmem>>, vector<4x17xf32>
    %1 = arith.truncf %0 : vector<4x17xf32> to vector<4x17xbf16>
    %c0_1 = arith.constant 0 : index
    %c0_2 = arith.constant 0 : index
    %2 = vector.load %arg2[%c0_1, %c0_2] : memref<4x6xf32, #tpu.memory_space<vmem>>, vector<4x6xf32>
    %3 = arith.truncf %2 : vector<4x6xf32> to vector<4x6xbf16>
    %c0_3 = arith.constant 0 : index
    %c0_4 = arith.constant 0 : index
    %4 = vector.load %arg5[%c0_3, %c0_4] : memref<256x512xbf16, #tpu.memory_space<vmem>>, vector<256x256xbf16>
    %c0_5 = arith.constant 0 : index
    %c256 = arith.constant 256 : index
    %5 = vector.load %arg5[%c0_5, %c256] : memref<256x512xbf16, #tpu.memory_space<vmem>>, vector<256x256xbf16>
    %c0_6 = arith.constant 0 : index
    %c0_7 = arith.constant 0 : index
    %6 = vector.load %arg6[%c0_6, %c0_7] : memref<3x256xf32, #tpu.memory_space<vmem>>, vector<1x256xf32>
    %c1 = arith.constant 1 : index
    %c0_8 = arith.constant 0 : index
    %7 = vector.load %arg6[%c1, %c0_8] : memref<3x256xf32, #tpu.memory_space<vmem>>, vector<1x256xf32>
    %c2 = arith.constant 2 : index
    %c0_9 = arith.constant 0 : index
    %8 = vector.load %arg6[%c2, %c0_9] : memref<3x256xf32, #tpu.memory_space<vmem>>, vector<1x256xf32>
    %c0_10 = arith.constant 0 : index
    %c0_11 = arith.constant 0 : index
    %9 = vector.load %arg3[%c0_10, %c0_11] : memref<17x256xbf16, #tpu.memory_space<vmem>>, vector<17x256xbf16>
    %cst = arith.constant dense<0.000000e+00> : vector<4x256xf32>
    %10 = tpu.matmul %1, %9, %cst {dimension_numbers = #tpu.dot_dimension_numbers<[1], [0], [0], [1], [0, 0, 1, 1], [], []>} : vector<4x17xbf16>, vector<17x256xbf16>, vector<4x256xf32> -> vector<4x256xf32>
    %c0_12 = arith.constant 0 : index
    %c0_13 = arith.constant 0 : index
    %11 = vector.load %arg4[%c0_12, %c0_13] : memref<6x256xbf16, #tpu.memory_space<vmem>>, vector<6x256xbf16>
    %cst_14 = arith.constant dense<0.000000e+00> : vector<4x256xf32>
    %12 = tpu.matmul %3, %11, %cst_14 {dimension_numbers = #tpu.dot_dimension_numbers<[1], [0], [0], [1], [0, 0, 1, 1], [], []>} : vector<4x6xbf16>, vector<6x256xbf16>, vector<4x256xf32> -> vector<4x256xf32>
    %13 = arith.addf %10, %12 : vector<4x256xf32>
    %14 = vector.broadcast %6 : vector<1x256xf32> to vector<4x256xf32>
    %15 = arith.addf %13, %14 : vector<4x256xf32>
    %cst_15 = arith.constant 0.000000e+00 : f32
    %16 = vector.broadcast %cst_15 : f32 to vector<4x256xf32>
    %17 = arith.maximumf %15, %16 : vector<4x256xf32>
    %18 = arith.truncf %17 : vector<4x256xf32> to vector<4x256xbf16>
    %cst_16 = arith.constant dense<0.000000e+00> : vector<4x256xf32>
    %19 = tpu.matmul %18, %4, %cst_16 {dimension_numbers = #tpu.dot_dimension_numbers<[1], [0], [0], [1], [0, 0, 1, 1], [], []>} : vector<4x256xbf16>, vector<256x256xbf16>, vector<4x256xf32> -> vector<4x256xf32>
    %20 = vector.broadcast %7 : vector<1x256xf32> to vector<4x256xf32>
    %21 = arith.addf %19, %20 : vector<4x256xf32>
    %cst_17 = arith.constant 0.000000e+00 : f32
    %22 = vector.broadcast %cst_17 : f32 to vector<4x256xf32>
    %23 = arith.maximumf %21, %22 : vector<4x256xf32>
    %24 = arith.truncf %23 : vector<4x256xf32> to vector<4x256xbf16>
    %cst_18 = arith.constant dense<0.000000e+00> : vector<4x256xf32>
    %25 = tpu.matmul %24, %5, %cst_18 {dimension_numbers = #tpu.dot_dimension_numbers<[1], [0], [0], [1], [0, 0, 1, 1], [], []>} : vector<4x256xbf16>, vector<256x256xbf16>, vector<4x256xf32> -> vector<4x256xf32>
    %26 = vector.broadcast %8 : vector<1x256xf32> to vector<4x256xf32>
    %27 = arith.addf %25, %26 : vector<4x256xf32>
    %c0_19 = arith.constant 0 : index
    %c0_20 = arith.constant 0 : index
    %28 = vector.load %arg7[%c0_19, %c0_20] : memref<4x256xf32, #tpu.memory_space<vmem>>, vector<4x256xf32>
    tpu.vector_store %arg7[%c0_19, %c0_20], %27 {strides = array<i32>} : memref<4x256xf32, #tpu.memory_space<vmem>>, vector<4x256xf32>,
    return
  }
  func.func @transform_0(%arg0: i32) -> (i32, i32) {
    %c0_i32 = arith.constant 0 : i32
    %c0_i32_0 = arith.constant 0 : i32
    return %arg0, %c0_i32 : i32, i32
  }
  func.func @transform_1(%arg0: i32) -> (i32, i32) {
    %c0_i32 = arith.constant 0 : i32
    %c0_i32_0 = arith.constant 0 : i32
    return %arg0, %c0_i32 : i32, i32
  }
  func.func @transform_2(%arg0: i32) -> (i32, i32) {
    %c0_i32 = arith.constant 0 : i32
    %c0_i32_0 = arith.constant 0 : i32
    %c0_i32_1 = arith.constant 0 : i32
    return %c0_i32, %c0_i32_0 : i32, i32
  }
  func.func @transform_3(%arg0: i32) -> (i32, i32) {
    %c0_i32 = arith.constant 0 : i32
    %c0_i32_0 = arith.constant 0 : i32
    %c0_i32_1 = arith.constant 0 : i32
    return %c0_i32, %c0_i32_0 : i32, i32
  }
  func.func @transform_4(%arg0: i32) -> (i32, i32) {
    %c0_i32 = arith.constant 0 : i32
    %c0_i32_0 = arith.constant 0 : i32
    %c0_i32_1 = arith.constant 0 : i32
    return %c0_i32, %c0_i32_0 : i32, i32
  }
  func.func @transform_5(%arg0: i32) -> (i32, i32) {
    %c0_i32 = arith.constant 0 : i32
    %c0_i32_0 = arith.constant 0 : i32
    %c0_i32_1 = arith.constant 0 : i32
    return %c0_i32, %c0_i32_0 : i32, i32
  }
  func.func @transform_6(%arg0: i32) -> (i32, i32) {
    %c0_i32 = arith.constant 0 : i32
    %c0_i32_0 = arith.constant 0 : i32
    return %arg0, %c0_i32 : i32, i32
  }
}

module attributes {stable_mosaic.version = 11 : i64} {
  func.func @_mlp_kernel(%arg0: i32, %arg1: memref<4x17xf32, #tpu.memory_space<vmem>>, %arg2: memref<4x6xf32, #tpu.memory_space<vmem>>, %arg3: memref<17x256xbf16, #tpu.memory_space<vmem>>, %arg4: memref<6x256xbf16, #tpu.memory_space<vmem>>, %arg5: memref<256x512xbf16, #tpu.memory_space<vmem>>, %arg6: memref<3x256xf32, #tpu.memory_space<vmem>>, %arg7: memref<4x256xf32, #tpu.memory_space<vmem>>) attributes {dimension_semantics = [#tpu.dimension_semantics<parallel>], iteration_bounds = array<i64: 1>, scalar_prefetch = 0 : i64, scratch_operands = 0 : i64, tpu.core_type = #tpu.core_type<tc>, window_params = [{transform_indices = @transform_0, window_bounds = array<i64: 4, 17>}, {transform_indices = @transform_1, window_bounds = array<i64: 4, 6>}, {pipeline_mode = #tpu.pipeline_mode<synchronous>, transform_indices = @transform_2, window_bounds = array<i64: 17, 256>}, {pipeline_mode = #tpu.pipeline_mode<synchronous>, transform_indices = @transform_3, window_bounds = array<i64: 6, 256>}, {pipeline_mode = #tpu.pipeline_mode<synchronous>, transform_indices = @transform_4, window_bounds = array<i64: 256, 512>}, {pipeline_mode = #tpu.pipeline_mode<synchronous>, transform_indices = @transform_5, window_bounds = array<i64: 3, 256>}, {transform_indices = @transform_6, window_bounds = array<i64: 4, 256>}]} {
    %c0 = arith.constant 0 : index
    %c0_0 = arith.constant 0 : index
    %0 = vector.load %arg1[%c0, %c0_0] : memref<4x17xf32, #tpu.memory_space<vmem>>, vector<4x17xf32>
    %1 = arith.truncf %0 : vector<4x17xf32> to vector<4x17xbf16>
    %c0_1 = arith.constant 0 : index
    %c0_2 = arith.constant 0 : index
    %2 = vector.load %arg2[%c0_1, %c0_2] : memref<4x6xf32, #tpu.memory_space<vmem>>, vector<4x6xf32>
    %3 = arith.truncf %2 : vector<4x6xf32> to vector<4x6xbf16>
    %c0_3 = arith.constant 0 : index
    %c0_4 = arith.constant 0 : index
    %4 = vector.load %arg5[%c0_3, %c0_4] : memref<256x512xbf16, #tpu.memory_space<vmem>>, vector<256x256xbf16>
    %c0_5 = arith.constant 0 : index
    %c256 = arith.constant 256 : index
    %5 = vector.load %arg5[%c0_5, %c256] : memref<256x512xbf16, #tpu.memory_space<vmem>>, vector<256x256xbf16>
    %c0_6 = arith.constant 0 : index
    %c0_7 = arith.constant 0 : index
    %6 = vector.load %arg6[%c0_6, %c0_7] : memref<3x256xf32, #tpu.memory_space<vmem>>, vector<1x256xf32>
    %c1 = arith.constant 1 : index
    %c0_8 = arith.constant 0 : index
    %7 = vector.load %arg6[%c1, %c0_8] : memref<3x256xf32, #tpu.memory_space<vmem>>, vector<1x256xf32>
    %c2 = arith.constant 2 : index
    %c0_9 = arith.constant 0 : index
    %8 = vector.load %arg6[%c2, %c0_9] : memref<3x256xf32, #tpu.memory_space<vmem>>, vector<1x256xf32>
    %c0_10 = arith.constant 0 : index
    %c0_11 = arith.constant 0 : index
    %9 = vector.load %arg3[%c0_10, %c0_11] : memref<17x256xbf16, #tpu.memory_space<vmem>>, vector<17x256xbf16>
    %cst = arith.constant dense<0.000000e+00> : vector<4x256xf32>
    %10 = tpu.matmul %1, %9, %cst {dimension_numbers = #tpu.dot_dimension_numbers<[1], [0], [0], [1], [0, 0, 1, 1], [], []>} : vector<4x17xbf16>, vector<17x256xbf16>, vector<4x256xf32> -> vector<4x256xf32>
    %c0_12 = arith.constant 0 : index
    %c0_13 = arith.constant 0 : index
    %11 = vector.load %arg4[%c0_12, %c0_13] : memref<6x256xbf16, #tpu.memory_space<vmem>>, vector<6x256xbf16>
    %cst_14 = arith.constant dense<0.000000e+00> : vector<4x256xf32>
    %12 = tpu.matmul %3, %11, %cst_14 {dimension_numbers = #tpu.dot_dimension_numbers<[1], [0], [0], [1], [0, 0, 1, 1], [], []>} : vector<4x6xbf16>, vector<6x256xbf16>, vector<4x256xf32> -> vector<4x256xf32>
    %13 = arith.addf %10, %12 : vector<4x256xf32>
    %14 = vector.broadcast %6 : vector<1x256xf32> to vector<4x256xf32>
    %15 = arith.addf %13, %14 : vector<4x256xf32>
    %cst_15 = arith.constant 0.000000e+00 : f32
    %16 = vector.broadcast %cst_15 : f32 to vector<4x256xf32>
    %17 = arith.maximumf %15, %16 : vector<4x256xf32>
    %18 = arith.truncf %17 : vector<4x256xf32> to vector<4x256xbf16>
    %cst_16 = arith.constant dense<0.000000e+00> : vector<4x256xf32>
    %19 = tpu.matmul %18, %4, %cst_16 {dimension_numbers = #tpu.dot_dimension_numbers<[1], [0], [0], [1], [0, 0, 1, 1], [], []>} : vector<4x256xbf16>, vector<256x256xbf16>, vector<4x256xf32> -> vector<4x256xf32>
    %20 = vector.broadcast %7 : vector<1x256xf32> to vector<4x256xf32>
    %21 = arith.addf %19, %20 : vector<4x256xf32>
    %cst_17 = arith.constant 0.000000e+00 : f32
    %22 = vector.broadcast %cst_17 : f32 to vector<4x256xf32>
    %23 = arith.maximumf %21, %22 : vector<4x256xf32>
    %24 = arith.truncf %23 : vector<4x256xf32> to vector<4x256xbf16>
    %cst_18 = arith.constant dense<0.000000e+00> : vector<4x256xf32>
    %25 = tpu.matmul %24, %5, %cst_18 {dimension_numbers = #tpu.dot_dimension_numbers<[1], [0], [0], [1], [0, 0, 1, 1], [], []>} : vector<4x256xbf16>, vector<256x256xbf16>, vector<4x256xf32> -> vector<4x256xf32>
    %26 = vector.broadcast %8 : vector<1x256xf32> to vector<4x256xf32>
    %27 = arith.addf %25, %26 : vector<4x256xf32>
    %c0_19 = arith.constant 0 : index
    %c0_20 = arith.constant 0 : index
    %28 = vector.load %arg7[%c0_19, %c0_20] : memref<4x256xf32, #tpu.memory_space<vmem>>, vector<4x256xf32>
    tpu.vector_store %arg7[%c0_19, %c0_20], %27 {strides = array<i32>} : memref<4x256xf32, #tpu.memory_space<vmem>>, vector<4x256xf32>,
    return
  }
  func.func @transform_0(%arg0: i32) -> (i32, i32) {
    %c0_i32 = arith.constant 0 : i32
    %c0_i32_0 = arith.constant 0 : i32
    return %arg0, %c0_i32 : i32, i32
  }
  func.func @transform_1(%arg0: i32) -> (i32, i32) {
    %c0_i32 = arith.constant 0 : i32
    %c0_i32_0 = arith.constant 0 : i32
    return %arg0, %c0_i32 : i32, i32
  }
  func.func @transform_2(%arg0: i32) -> (i32, i32) {
    %c0_i32 = arith.constant 0 : i32
    %c0_i32_0 = arith.constant 0 : i32
    %c0_i32_1 = arith.constant 0 : i32
    return %c0_i32, %c0_i32_0 : i32, i32
  }
  func.func @transform_3(%arg0: i32) -> (i32, i32) {
    %c0_i32 = arith.constant 0 : i32
    %c0_i32_0 = arith.constant 0 : i32
    %c0_i32_1 = arith.constant 0 : i32
    return %c0_i32, %c0_i32_0 : i32, i32
  }
  func.func @transform_4(%arg0: i32) -> (i32, i32) {
    %c0_i32 = arith.constant 0 : i32
    %c0_i32_0 = arith.constant 0 : i32
    %c0_i32_1 = arith.constant 0 : i32
    return %c0_i32, %c0_i32_0 : i32, i32
  }
  func.func @transform_5(%arg0: i32) -> (i32, i32) {
    %c0_i32 = arith.constant 0 : i32
    %c0_i32_0 = arith.constant 0 : i32
    %c0_i32_1 = arith.constant 0 : i32
    return %c0_i32, %c0_i32_0 : i32, i32
  }
  func.func @transform_6(%arg0: i32) -> (i32, i32) {
    %c0_i32 = arith.constant 0 : i32
    %c0_i32_0 = arith.constant 0 : i32
    return %arg0, %c0_i32 : i32, i32
  }
}

</mosaic_0001>

<bundles_post_ra>
// kernel: tpu_custom_call.1
= control target key start
LH: loop header
LB: loop body
LE: loop exit
PB: predicated region body
PF: predicated region fallthrough
CT: control target
= control target key end

     0   :  { %11 = vsyncpa [#allocation3], 0  ;;  %s1169_s0 = inlined_call_operand.hbm [shape: f32[4,17], index: 0, kind: input, shape index: {}]   ;;  %s1170_s1 = inlined_call_operand.hbm [shape: f32[4,6], index: 1, kind: input, shape index: {}]   ;;  %s1171_s2 = inlined_call_operand.hbm [shape: bf16[17,256], index: 2, kind: input, shape index: {}]   ;;  %s1172_s3 = inlined_call_operand.vmem [shape: bf16[6,256], index: 3, kind: input, shape index: {}]   ;;  %s1173_s4 = inlined_call_operand.hbm [shape: bf16[256,512], index: 4, kind: input, shape index: {}]   ;;  %s1174_s5 = inlined_call_operand.vmem [shape: f32[3,256], index: 5, kind: input, shape index: {}]   ;;  %s1175_s6 = inlined_call_operand.hbm [shape: f32[4,256], index: 6, kind: output, shape index: {}]  }
   0x1   :  { %12 = vsyncpa [#allocation6], 0 }
   0x2   :  { %13 = vsyncpa [#allocation9], 0 }
   0x3   :  { %14 = vsyncpa [#allocation4], 0  ;;  %s1052_s21 = smov [#allocation5]   ;;  %s1053_s23 = smov [#allocation2]  }
   0x4   :  { %s31_s22 = sshll.u32 %s1052_s21, 4  ;;  %s21_s24 = sshll.u32 %s1053_s23, 4  ;;  %s32_s22 = int_to_ptr.vmem [resolvable:$true] %s31_s22  ;;  %s22_s24 = int_to_ptr.vmem [resolvable:$true] %s21_s24 }
   0x5   :  { %s934_s27 = scalar_lea.hbm %s1170_s1, 64 }
   0x6   :  { %p935_p0 = scmp.ne.s32.totalorder %s1170_s1, %s934_s27  ;;  %p938_p1 = scmp.lt.u32.totalorder %s934_s27, %s1170_s1 }
   0x8   :  { %p940_p2 = pnand %p938_p1, %p935_p0 }
   0xa   :  { %943 = shalt.err (!%p940_p2)
}
   0xb   :  { %s944_s8 = scalar_lea.vmem %s32_s22, 64  ;;  %p949_p4 = scmp.lt.s32.totalorder %s32_s22, %s32_s22 }
   0xc   :  { %p945_p3 = scmp.ne.s32.totalorder %s32_s22, %s944_s8  ;;  %p950_p5 = scmp.lt.s32.totalorder %s944_s8, %s944_s8 }
   0xe   :  { %p951_p6 = por %p950_p5, %p949_p4 }
  0x10   :  { %p952_p7 = pnand %p951_p6, %p945_p3 }
  0x12   :  { %955 = shalt.err (!%p952_p7)
}
  0x13   :  { %34 = dma.hbm_to_vmem [thread:$0]  %s1170_s1, 64, %s32_s22, [#allocation6]  }
  0x14   :  { %s956_s13 = scalar_lea.hbm %s1169_s0, 64 }
  0x15   :  { %p957_p8 = scmp.ne.s32.totalorder %s1169_s0, %s956_s13  ;;  %p960_p9 = scmp.lt.u32.totalorder %s956_s13, %s1169_s0 }
  0x17   :  { %p962_p10 = pnand %p960_p9, %p957_p8 }
  0x19   :  { %965 = shalt.err (!%p962_p10)
}
  0x1a   :  { %s966_s18 = scalar_lea.vmem %s22_s24, 64  ;;  %p971_p12 = scmp.lt.s32.totalorder %s22_s24, %s22_s24 }
  0x1b   :  { %p967_p11 = scmp.ne.s32.totalorder %s22_s24, %s966_s18  ;;  %p972_p13 = scmp.lt.s32.totalorder %s966_s18, %s966_s18 }
  0x1d   :  { %p973_p0 = por %p972_p13, %p971_p12 }
  0x1f   :  { %p974_p1 = pnand %p973_p0, %p967_p11 }
  0x21   :  { %977 = shalt.err (!%p974_p1)
}
  0x22   :  { %24 = dma.hbm_to_vmem [thread:$0]  %s1169_s0, 64, %s22_s24, [#allocation3]  }
  0x23   :  { %s1054_s20 = smov [#allocation7]   ;;  %s978_s25 = scalar_lea.hbm %s1171_s2, 384 }
  0x24   :  { %s40_s21 = sshll.u32 %s1054_s20, 4  ;;  %p979_p2 = scmp.ne.s32.totalorder %s1171_s2, %s978_s25  ;;  %s41_s21 = int_to_ptr.vmem [resolvable:$true] %s40_s21 }
  0x25   :  { %p982_p3 = scmp.lt.u32.totalorder %s978_s25, %s1171_s2 }
  0x27   :  { %p984_p4 = pnand %p982_p3, %p979_p2 }
  0x29   :  { %987 = shalt.err (!%p984_p4)
}
  0x2a   :  { %s988_s30 = scalar_lea.vmem %s41_s21, 384  ;;  %p993_p6 = scmp.lt.s32.totalorder %s41_s21, %s41_s21 }
  0x2b   :  { %p989_p5 = scmp.ne.s32.totalorder %s41_s21, %s988_s30  ;;  %p994_p7 = scmp.lt.s32.totalorder %s988_s30, %s988_s30 }
  0x2d   :  { %p995_p8 = por %p994_p7, %p993_p6 }
  0x2f   :  { %p996_p9 = pnand %p995_p8, %p989_p5 }
  0x31   :  { %999 = shalt.err (!%p996_p9)
}
  0x32   :  { %s1055_s0 = smov 128   ;;  %s1056_s24 = smov 8  }
  0x33   :  { %46 = dma.hbm_to_vmem [thread:$0]  %s1171_s2, 384, %s41_s21, [#allocation6], %s1055_s0, %s1055_s0, %s1056_s24  }
  0x34   :  { %s1057_s9 = smov [#allocation8]   ;;  %s1000_s13 = scalar_lea.hbm %s1173_s4, 8192 }
  0x35   :  { %s54_s10 = sshll.u32 %s1057_s9, 4  ;;  %p1001_p10 = scmp.ne.s32.totalorder %s1173_s4, %s1000_s13  ;;  %s55_s10 = int_to_ptr.vmem [resolvable:$true] %s54_s10 }
  0x36   :  { %p1004_p11 = scmp.lt.u32.totalorder %s1000_s13, %s1173_s4 }
  0x38   :  { %p1006_p12 = pnand %p1004_p11, %p1001_p10 }
  0x3a   :  { %1009 = shalt.err (!%p1006_p12)
}
  0x3b   :  { %s1010_s18 = scalar_lea.vmem %s55_s10, 8192  ;;  %p1015_p0 = scmp.lt.s32.totalorder %s55_s10, %s55_s10 }
  0x3c   :  { %p1011_p13 = scmp.ne.s32.totalorder %s55_s10, %s1010_s18  ;;  %p1016_p1 = scmp.lt.s32.totalorder %s1010_s18, %s1010_s18 }
  0x3e   :  { %p1017_p2 = por %p1016_p1, %p1015_p0 }
  0x40   :  { %p1018_p3 = pnand %p1017_p2, %p1011_p13 }
  0x42   :  { %1021 = shalt.err (!%p1018_p3)
}
  0x43   :  { %s1058_s2 = smov 256   ;;  %s1059_s1 = smov 16  }
  0x44   :  { %60 = dma.hbm_to_vmem [thread:$0]  %s1173_s4, 8192, %s55_s10, [#allocation9], %s1058_s2, %s1058_s2, %s1059_s1  }
  0x45   :  { %1044 = dma.done.wait [#allocation3], 64  }
  0x46   :  { %1045 = vsyncadd [#allocation3], 4294967232 }
  0x47   :  { %1046 = dma.done.wait [#allocation6], 448  }
  0x48   :  { %1047 = vsyncadd [#allocation6], 4294966848 }
  0x49   :  { %1048 = dma.done.wait [#allocation9], 8192  }
  0x4a   :  { %1049 = vsyncadd [#allocation9], 4294959104  ;;  %v1060_v0 = vmov 0   ;;  %vm229_vm0 = vcmask 1040384   ;;  %v831_v1 = vld [vmem:[#allocation7 + $0x4] ss:$8 sps:$4 sm:$0xff]  }
  0x4b   :  { %201 = vmatprep.mubr.bf16.mxu0 %v1060_v0  ;;  %270 = vmatprep.mubr.bf16.mxu1 %v1060_v0  ;;  %vm162_vm1 = vcmask 1042432   ;;  %v231_v2 = vsel %vm229_vm0, 65535, %v1060_v0  ;;  %v152_v3 = vld [vmem:[%s1172_s3] sm:$0x77]  ;;  %v151_v5 = vld [vmem:[#allocation7 + $0x10] sm:$0x11] }
  0x4c   :  { %v834_v4 = vld [vmem:[#allocation7] ss:$8 sps:$4 sm:$0xff]   ;;  %238 = vmatprep.subr.bf16.mxu1 %v831_v1  ;;  %v749_v6 = vcombine.high %v152_v3, %v152_v3  ;;  %v748_v7 = vcombine.low %v152_v3, %v152_v3  ;;  %v755_v8 = vcombine.high %v151_v5, %v151_v5  ;;  %v78_v9 = vld [vmem:[#allocation5] sm:$0xf]  ;;  %v754_v10 = vcombine.low %v151_v5, %v151_v5  ;;  %v76_v11 = vld [vmem:[#allocation2] sm:$0xf] }
  0x4d   :  { %239 = vmatpush1.bf16.msra.mxu1 %v834_v4  ;;  %v840_v12 = vld [vmem:[#allocation8 + $0x4] ss:$16 sps:$4 sm:$0xff]   ;;  %v79_v15 = vpack.c.bf16 %v78_v9, %v78_v9  ;;  %vm158_vm2 = vcmask 48128   ;;  %v838_v17 = vld [vmem:[#allocation8] ss:$16 sps:$4 sm:$0xff]   ;;  %v77_v18 = vpack.c.bf16 %v76_v11, %v76_v11  ;;  %vm225_vm3 = vcmask 138240  }
  0x4e   :  { %750 = vmatprep.subr.msk.bf16.mxu0 %vm162_vm1, %v749_v6  ;;  %v164_v13 = vsel %vm162_vm1, %v748_v7, 0  ;;  %v236_v14 = vand.u32 %v755_v8, %v231_v2  ;;  %v233_v16 = vand.u32 %v754_v10, %v231_v2  ;;  %v843_v19 = vld [vmem:[#allocation8 + $0x24] ss:$16 sps:$4 sm:$0xff]   ;;  %v841_v20 = vld [vmem:[#allocation8 + $0x20] ss:$16 sps:$4 sm:$0xff]   ;;  %s1061_s28 = smov [#allocation10]  }
  0x4f   :  { %170 = vmatpush1.bf16.msra.mxu0 %v164_v13  ;;  %v846_v21 = vld [vmem:[#allocation8 + $0x44] ss:$16 sps:$4 sm:$0xff]   ;;  %v844_v22 = vld [vmem:[#allocation8 + $0x40] ss:$16 sps:$4 sm:$0xff]   ;;  %v886_v49 = vld [vmem:[#allocation8 + $0x8] ss:$16 sps:$4 sm:$0xff]   ;;  %v280_v13 = vlaneseq }
  0x50   :  { %240 = vmatprep.subr.bf16.mxu1 %v236_v14  ;;  %467 = vmatprep.subr.bf16.mxu0 %v840_v12  ;;  %v849_v23 = vld [vmem:[#allocation8 + $0x64] ss:$16 sps:$4 sm:$0xff]   ;;  %v847_v24 = vld [vmem:[#allocation8 + $0x60] ss:$16 sps:$4 sm:$0xff]   ;;  %v888_v50 = vld [vmem:[#allocation8 + $0xc] ss:$16 sps:$4 sm:$0xff]  }
  0x51   :  { %241 = vmatpush1.bf16.msra.mxu1 %v233_v16  ;;  %v852_v25 = vld [vmem:[#allocation8 + $0x84] ss:$16 sps:$4 sm:$0xff]   ;;  %v850_v26 = vld [vmem:[#allocation8 + $0x80] ss:$16 sps:$4 sm:$0xff]   ;;  %v891_v51 = vld [vmem:[#allocation8 + $0x2c] ss:$16 sps:$4 sm:$0xff]  }
  0x52   :  { %751 = vmatmul.mubr.msk.bf16.vlgmr.msra.gmra.mrb[0].mxu0 %vm158_vm2, %v79_v15  ;;  %v855_v27 = vld [vmem:[#allocation8 + $0xa4] ss:$16 sps:$4 sm:$0xff]   ;;  %v853_v28 = vld [vmem:[#allocation8 + $0xa0] ss:$16 sps:$4 sm:$0xff]   ;;  %683 = vmatprep.subr.bf16.mxu1 %v888_v50  ;;  %v889_v52 = vld [vmem:[#allocation8 + $0x28] ss:$16 sps:$4 sm:$0xff]  }
  0x53   :  { %468 = vmatpush1.bf16.msra.mxu0 %v838_v17  ;;  %v858_v29 = vld [vmem:[#allocation8 + $0xc4] ss:$16 sps:$4 sm:$0xff]   ;;  %v856_v30 = vld [vmem:[#allocation8 + $0xc0] ss:$16 sps:$4 sm:$0xff]   ;;  %v894_v53 = vld [vmem:[#allocation8 + $0x4c] ss:$16 sps:$4 sm:$0xff]  }
  0x54   :  { %756 = vmatmul.mubr.msk.bf16.vlgmr.msra.gmra.mrb[0].mxu1 %vm225_vm3, %v77_v18  ;;  %469 = vmatprep.subr.bf16.mxu0 %v843_v19  ;;  %v861_v31 = vld [vmem:[#allocation8 + $0xe4] ss:$16 sps:$4 sm:$0xff]   ;;  %v859_v32 = vld [vmem:[#allocation8 + $0xe0] ss:$16 sps:$4 sm:$0xff]   ;;  %v892_v54 = vld [vmem:[#allocation8 + $0x48] ss:$16 sps:$4 sm:$0xff]  }
  0x55   :  { %v864_v33 = vld [vmem:[#allocation8 + $0x104] ss:$16 sps:$4 sm:$0xff]   ;;  %v862_v34 = vld [vmem:[#allocation8 + $0x100] ss:$16 sps:$4 sm:$0xff]   ;;  %684 = vmatpush1.bf16.msra.mxu1 %v886_v49  ;;  %v897_v55 = vld [vmem:[#allocation8 + $0x6c] ss:$16 sps:$4 sm:$0xff]  }
  0x56   :  { %v867_v35 = vld [vmem:[#allocation8 + $0x124] ss:$16 sps:$4 sm:$0xff]   ;;  %v865_v36 = vld [vmem:[#allocation8 + $0x120] ss:$16 sps:$4 sm:$0xff]   ;;  %685 = vmatprep.subr.bf16.mxu1 %v891_v51  ;;  %v895_v56 = vld [vmem:[#allocation8 + $0x68] ss:$16 sps:$4 sm:$0xff]  }
  0x57   :  { %470 = vmatpush1.bf16.msra.mxu0 %v841_v20  ;;  %v870_v37 = vld [vmem:[#allocation8 + $0x144] ss:$16 sps:$4 sm:$0xff]   ;;  %v868_v38 = vld [vmem:[#allocation8 + $0x140] ss:$16 sps:$4 sm:$0xff]   ;;  %v900_v57 = vld [vmem:[#allocation8 + $0x8c] ss:$16 sps:$4 sm:$0xff]  }
  0x58   :  { %471 = vmatprep.subr.bf16.mxu0 %v846_v21  ;;  %v873_v39 = vld [vmem:[#allocation8 + $0x164] ss:$16 sps:$4 sm:$0xff]   ;;  %v871_v40 = vld [vmem:[#allocation8 + $0x160] ss:$16 sps:$4 sm:$0xff]   ;;  %v898_v58 = vld [vmem:[#allocation8 + $0x88] ss:$16 sps:$4 sm:$0xff]  }
  0x59   :  { %v876_v41 = vld [vmem:[#allocation8 + $0x184] ss:$16 sps:$4 sm:$0xff]   ;;  %v874_v42 = vld [vmem:[#allocation8 + $0x180] ss:$16 sps:$4 sm:$0xff]   ;;  %686 = vmatpush1.bf16.msra.mxu1 %v889_v52  ;;  %v903_v59 = vld [vmem:[#allocation8 + $0xac] ss:$16 sps:$4 sm:$0xff]  }
  0x5a   :  { %v879_v43 = vld [vmem:[#allocation8 + $0x1a4] ss:$16 sps:$4 sm:$0xff]   ;;  %v877_v44 = vld [vmem:[#allocation8 + $0x1a0] ss:$16 sps:$4 sm:$0xff]   ;;  %687 = vmatprep.subr.bf16.mxu1 %v894_v53  ;;  %v901_v60 = vld [vmem:[#allocation8 + $0xa8] ss:$16 sps:$4 sm:$0xff]  }
  0x5b   :  { %472 = vmatpush1.bf16.msra.mxu0 %v844_v22  ;;  %v882_v45 = vld [vmem:[#allocation8 + $0x1c4] ss:$16 sps:$4 sm:$0xff]   ;;  %v880_v46 = vld [vmem:[#allocation8 + $0x1c0] ss:$16 sps:$4 sm:$0xff]   ;;  %v906_v61 = vld [vmem:[#allocation8 + $0xcc] ss:$16 sps:$4 sm:$0xff]  }
  0x5c   :  { %473 = vmatprep.subr.bf16.mxu0 %v849_v23  ;;  %v885_v47 = vld [vmem:[#allocation8 + $0x1e4] ss:$16 sps:$4 sm:$0xff]   ;;  %v883_v48 = vld [vmem:[#allocation8 + $0x1e0] ss:$16 sps:$4 sm:$0xff]   ;;  %v904_v62 = vld [vmem:[#allocation8 + $0xc8] ss:$16 sps:$4 sm:$0xff]  }
  0x5d   :  { %688 = vmatpush1.bf16.msra.mxu1 %v892_v54  ;;  %v909_v63 = vld [vmem:[#allocation8 + $0xec] ss:$16 sps:$4 sm:$0xff]   ;;  %v907_v0 = vld [vmem:[#allocation8 + $0xe8] ss:$16 sps:$4 sm:$0xff]   ;;  %v281_v14 = vshrl.u32 %v280_v13, 7  ;;  %s735_s29 = sshll.u32 %s1061_s28, 4  ;;  %s736_s29 = int_to_ptr.vmem [resolvable:$true] %s735_s29 }
  0x5e   :  { %689 = vmatprep.subr.bf16.mxu1 %v897_v55  ;;  %v912_v1 = vld [vmem:[#allocation8 + $0x10c] ss:$16 sps:$4 sm:$0xff]   ;;  %v910_v2 = vld [vmem:[#allocation8 + $0x108] ss:$16 sps:$4 sm:$0xff]   ;;  %s1022_s30 = scalar_lea.vmem %s736_s29, 128  ;;  %p1027_p5 = scmp.lt.s32.totalorder %s736_s29, %s736_s29 }
  0x5f   :  { %474 = vmatpush1.bf16.msra.mxu0 %v847_v24  ;;  %v915_v3 = vld [vmem:[#allocation8 + $0x12c] ss:$16 sps:$4 sm:$0xff]   ;;  %v913_v4 = vld [vmem:[#allocation8 + $0x128] ss:$16 sps:$4 sm:$0xff]   ;;  %v282_v15 = vsub.s32 0, %v281_v14  ;;  %v286_v17 = vsub.s32 1, %v281_v14  ;;  %p1023_p4 = scmp.ne.s32.totalorder %s736_s29, %s1022_s30  ;;  %p1028_p6 = scmp.lt.s32.totalorder %s1022_s30, %s1022_s30 }
  0x60   :  { %475 = vmatprep.subr.bf16.mxu0 %v852_v25  ;;  %v918_v5 = vld [vmem:[#allocation8 + $0x14c] ss:$16 sps:$4 sm:$0xff]   ;;  %v916_v6 = vld [vmem:[#allocation8 + $0x148] ss:$16 sps:$4 sm:$0xff]  }
  0x61   :  { %690 = vmatpush1.bf16.msra.mxu1 %v895_v56  ;;  %v921_v7 = vld [vmem:[#allocation8 + $0x16c] ss:$16 sps:$4 sm:$0xff]   ;;  %v919_v8 = vld [vmem:[#allocation8 + $0x168] ss:$16 sps:$4 sm:$0xff]   ;;  %p1029_p7 = por %p1028_p6, %p1027_p5 }
  0x62   :  { %691 = vmatprep.subr.bf16.mxu1 %v900_v57  ;;  %v924_v9 = vld [vmem:[#allocation8 + $0x18c] ss:$16 sps:$4 sm:$0xff]   ;;  %v922_v10 = vld [vmem:[#allocation8 + $0x188] ss:$16 sps:$4 sm:$0xff]  }
  0x63   :  { %476 = vmatpush1.bf16.msra.mxu0 %v850_v26  ;;  %v927_v11 = vld [vmem:[#allocation8 + $0x1ac] ss:$16 sps:$4 sm:$0xff]   ;;  %v925_v12 = vld [vmem:[#allocation8 + $0x1a8] ss:$16 sps:$4 sm:$0xff]   ;;  %p1030_p8 = pnand %p1029_p7, %p1023_p4 }
  0x64   :  { %477 = vmatprep.subr.bf16.mxu0 %v855_v27  ;;  %v144_v16 = vld [vmem:[%s1174_s5] ss:$4 sm:$0x3]  ;;  %v747_v53 = vld [vmem:[%s1174_s5 + $0x2] ss:$4 sm:$0x3] }
  0x65   :  { %692 = vmatpush1.bf16.msra.mxu1 %v898_v58  ;;  %v283_v20 = vrot.slane %v144_v16, %v282_v15  ;;  %v287_v23 = vrot.slane %v144_v16, %v286_v17  ;;  %v516_v54 = vrot.slane %v747_v53, %v282_v15  ;;  %v520_v55 = vrot.slane %v747_v53, %v286_v17 }
  0x66   :  { %693 = vmatprep.subr.bf16.mxu1 %v903_v59 }
  0x67   :  { %478 = vmatpush1.bf16.msra.mxu0 %v853_v28 }
  0x68   :  { %479 = vmatprep.subr.bf16.mxu0 %v858_v29 }
  0x69   :  { %694 = vmatpush1.bf16.msra.mxu1 %v901_v60 }
  0x6a   :  { %695 = vmatprep.subr.bf16.mxu1 %v906_v61 }
  0x6b   :  { %480 = vmatpush1.bf16.msra.mxu0 %v856_v30 }
  0x6c   :  { %481 = vmatprep.subr.bf16.mxu0 %v861_v31 }
  0x6d   :  { %696 = vmatpush1.bf16.msra.mxu1 %v904_v62 }
  0x6e   :  { %697 = vmatprep.subr.bf16.mxu1 %v909_v63 }
  0x6f   :  { %482 = vmatpush1.bf16.msra.mxu0 %v859_v32 }
  0x70   :  { %483 = vmatprep.subr.bf16.mxu0 %v864_v33 }
  0x71   :  { %698 = vmatpush1.bf16.msra.mxu1 %v907_v0 }
  0x72   :  { %699 = vmatprep.subr.bf16.mxu1 %v912_v1 }
  0x73   :  { %484 = vmatpush1.bf16.msra.mxu0 %v862_v34 }
  0x74   :  { %485 = vmatprep.subr.bf16.mxu0 %v867_v35 }
  0x75   :  { %700 = vmatpush1.bf16.msra.mxu1 %v910_v2 }
  0x76   :  { %701 = vmatprep.subr.bf16.mxu1 %v915_v3 }
  0x77   :  { %486 = vmatpush1.bf16.msra.mxu0 %v865_v36  ;;  %v930_v36 = vld [vmem:[#allocation8 + $0x1cc] ss:$16 sps:$4 sm:$0xff]  }
  0x78   :  { %487 = vmatprep.subr.bf16.mxu0 %v870_v37  ;;  %v928_v37 = vld [vmem:[#allocation8 + $0x1c8] ss:$16 sps:$4 sm:$0xff]  }
  0x79   :  { %702 = vmatpush1.bf16.msra.mxu1 %v913_v4 }
  0x7a   :  { %703 = vmatprep.subr.bf16.mxu1 %v918_v5 }
  0x7b   :  { %488 = vmatpush1.bf16.msra.mxu0 %v868_v38  ;;  %v933_v38 = vld [vmem:[#allocation8 + $0x1ec] ss:$16 sps:$4 sm:$0xff]  }
  0x7c   :  { %489 = vmatprep.subr.bf16.mxu0 %v873_v39  ;;  %v931_v39 = vld [vmem:[#allocation8 + $0x1e8] ss:$16 sps:$4 sm:$0xff]  }
  0x7d   :  { %704 = vmatpush1.bf16.msra.mxu1 %v916_v6 }
  0x7e   :  { %705 = vmatprep.subr.bf16.mxu1 %v921_v7 }
  0x7f   :  { %490 = vmatpush1.bf16.msra.mxu0 %v871_v40  ;;  %v746_v40 = vld [vmem:[%s1174_s5 + $0x1] ss:$4 sm:$0x3] }
  0x80   :  { %491 = vmatprep.subr.bf16.mxu0 %v876_v41  ;;  %v300_v41 = vrot.slane %v746_v40, %v282_v15 }
  0x81   :  { %706 = vmatpush1.bf16.msra.mxu1 %v919_v8 }
  0x82   :  { %707 = vmatprep.subr.bf16.mxu1 %v924_v9 }
  0x83   :  { %492 = vmatpush1.bf16.msra.mxu0 %v874_v42  ;;  %v304_v42 = vrot.slane %v746_v40, %v286_v17 }
  0x84   :  { %493 = vmatprep.subr.bf16.mxu0 %v879_v43 }
  0x85   :  { %708 = vmatpush1.bf16.msra.mxu1 %v922_v10 }
  0x86   :  { %709 = vmatprep.subr.bf16.mxu1 %v927_v11 }
  0x87   :  { %494 = vmatpush1.bf16.msra.mxu0 %v877_v44 }
  0x88   :  { %495 = vmatprep.subr.bf16.mxu0 %v882_v45 }
  0x89   :  { %710 = vmatpush1.bf16.msra.mxu1 %v925_v12 }
  0x8a   :  { %711 = vmatprep.subr.bf16.mxu1 %v930_v36 }
  0x8b   :  { %496 = vmatpush1.bf16.msra.mxu0 %v880_v46 }
  0x8c   :  { %497 = vmatprep.subr.bf16.mxu0 %v885_v47 }
  0x8d   :  { %712 = vmatpush1.bf16.msra.mxu1 %v928_v37 }
  0x8e   :  { %713 = vmatprep.subr.bf16.mxu1 %v933_v38 }
  0x8f   :  { %498 = vmatpush1.bf16.msra.mxu0 %v883_v48 }
  0x91   :  { %714 = vmatpush1.bf16.msra.mxu1 %v931_v39 }
 0x125   :  { %v203_v18 = vpop.f32.mrb[0].mxu0 }
 0x126   :  { %v205_v19 = vpop.f32.mrb[1].mxu0 }
 0x127   :  { %v207_v21 = vpop.f32.mrb[2].mxu0  ;;  %v272_v22 = vpop.f32.mrb[0].mxu1 }
 0x128   :  { %v208_v24 = vpop.f32.mrb[3].mxu0  ;;  %v273_v25 = vadd.f32 %v272_v22, %v203_v18  ;;  %v274_v26 = vpop.f32.mrb[1].mxu1 }
 0x129   :  { %v275_v27 = vadd.f32 %v274_v26, %v205_v19  ;;  %v276_v28 = vpop.f32.mrb[2].mxu1 }
 0x12a   :  { %v290_v29 = vadd.f32 %v283_v20, %v273_v25  ;;  %v277_v30 = vpop.f32.mrb[3].mxu1 }
 0x12b   :  { %v291_v31 = vadd.f32 %v287_v23, %v275_v27 }
 0x12c   :  { %v292_v32 = vmax.f32 %v290_v29, 0.0 }
 0x12d   :  { %v293_v33 = vmax.f32 %v291_v31, 0.0 }
 0x12e   :  { %v294_v35 = vpack.c.bf16 %v292_v32, %v292_v32 }
 0x12f   :  { %v295_v34 = vpack.c.bf16 %v293_v33, %v293_v33 }
 0x131   :  { %499 = vmatprep.mubr.bf16.mxu0 %v295_v34 }
 0x132   :  { %500 = vmatmul.mubr.bf16.vlgmr.msra.gmra.mrb[4].mxu0 %v294_v35 }
 0x205   :  { %v501_v43 = vpop.f32.mrb[4].mxu0 }
 0x206   :  { %v502_v44 = vadd.f32 %v501_v43, %v300_v41  ;;  %v503_v45 = vpop.f32.mrb[5].mxu0 }
 0x207   :  { %v504_v46 = vadd.f32 %v503_v45, %v304_v42  ;;  %v505_v47 = vpop.f32.mrb[6].mxu0 }
 0x208   :  { %v508_v48 = vmax.f32 %v502_v44, 0.0  ;;  %v506_v49 = vpop.f32.mrb[7].mxu0 }
 0x209   :  { %v509_v50 = vmax.f32 %v504_v46, 0.0 }
 0x20a   :  { %v510_v52 = vpack.c.bf16 %v508_v48, %v508_v48 }
 0x20b   :  { %v511_v51 = vpack.c.bf16 %v509_v50, %v509_v50 }
 0x20d   :  { %715 = vmatprep.mubr.bf16.mxu1 %v511_v51 }
 0x20e   :  { %716 = vmatmul.mubr.bf16.vlgmr.msra.gmra.mrb[4].mxu1 %v510_v52 }
 0x2e1   :  { %v717_v56 = vpop.f32.mrb[4].mxu1 }
 0x2e2   :  { %v718_v57 = vadd.f32 %v717_v56, %v516_v54  ;;  %v719_v58 = vpop.f32.mrb[5].mxu1 }
 0x2e3   :  { %v720_v59 = vadd.f32 %v719_v58, %v520_v55  ;;  %v721_v60 = vpop.f32.mrb[6].mxu1 }
 0x2e4   :  { %v722_v61 = vpop.f32.mrb[7].mxu1 }
 0x2e5   :  { %v726_v62 = vcombine.low %v718_v57, %v720_v59 }
 0x2e7   :  { %728 = vst [vmem:[#allocation10] sm:$0xff] %v726_v62 }
 0x2e8   :  { %1033 = shalt.err (!%p1030_p8)
}
 0x2e9   :  { %s1034_s24 = scalar_lea.hbm %s1175_s6, 128 }
 0x2ea   :  { %p1035_p9 = scmp.ne.s32.totalorder %s1175_s6, %s1034_s24  ;;  %p1038_p10 = scmp.lt.u32.totalorder %s1034_s24, %s1175_s6 }
 0x2ec   :  { %p1040_p11 = pnand %p1038_p10, %p1035_p9 }
 0x2ee   :  { %1043 = shalt.err (!%p1040_p11)
}
 0x2ef   :  { %738 = dma.vmem_to_hbm [thread:$0]  %s736_s29, 128, %s1175_s6, [#allocation4]  }
 0x2f0   :  { %1050 = dma.done.wait [#allocation4], 128  }
 0x2f1   :  { %1051 = vsyncadd [#allocation4], 4294967168 }
 0x2f2   :  { %742 = vsyncpa [#allocation3], 1 }
 0x2f3   :  { %743 = vsyncpa [#allocation6], 1 }
 0x2f4   :  { %744 = vsyncpa [#allocation9], 1 }
 0x2f5   :  { %745 = vsyncpa [#allocation4], 1 }

// kernel: tpu_custom_call.1
= control target key start
LH: loop header
LB: loop body
LE: loop exit
PB: predicated region body
PF: predicated region fallthrough
CT: control target
= control target key end

     0   :  { %11 = vsyncpa [#allocation3], 0  ;;  %s1169_s0 = inlined_call_operand.hbm [shape: f32[4,17], index: 0, kind: input, shape index: {}]   ;;  %s1170_s1 = inlined_call_operand.hbm [shape: f32[4,6], index: 1, kind: input, shape index: {}]   ;;  %s1171_s2 = inlined_call_operand.hbm [shape: bf16[17,256], index: 2, kind: input, shape index: {}]   ;;  %s1172_s3 = inlined_call_operand.vmem [shape: bf16[6,256], index: 3, kind: input, shape index: {}]   ;;  %s1173_s4 = inlined_call_operand.hbm [shape: bf16[256,512], index: 4, kind: input, shape index: {}]   ;;  %s1174_s5 = inlined_call_operand.vmem [shape: f32[3,256], index: 5, kind: input, shape index: {}]   ;;  %s1175_s6 = inlined_call_operand.hbm [shape: f32[4,256], index: 6, kind: output, shape index: {}]  }
   0x1   :  { %12 = vsyncpa [#allocation6], 0 }
   0x2   :  { %13 = vsyncpa [#allocation9], 0 }
   0x3   :  { %14 = vsyncpa [#allocation4], 0  ;;  %s1052_s21 = smov [#allocation5]   ;;  %s1053_s23 = smov [#allocation2]  }
   0x4   :  { %s31_s22 = sshll.u32 %s1052_s21, 4  ;;  %s21_s24 = sshll.u32 %s1053_s23, 4  ;;  %s32_s22 = int_to_ptr.vmem [resolvable:$true] %s31_s22  ;;  %s22_s24 = int_to_ptr.vmem [resolvable:$true] %s21_s24 }
   0x5   :  { %s934_s27 = scalar_lea.hbm %s1170_s1, 64 }
   0x6   :  { %p935_p0 = scmp.ne.s32.totalorder %s1170_s1, %s934_s27  ;;  %p938_p1 = scmp.lt.u32.totalorder %s934_s27, %s1170_s1 }
   0x8   :  { %p940_p2 = pnand %p938_p1, %p935_p0 }
   0xa   :  { %943 = shalt.err (!%p940_p2)
}
   0xb   :  { %s944_s8 = scalar_lea.vmem %s32_s22, 64  ;;  %p949_p4 = scmp.lt.s32.totalorder %s32_s22, %s32_s22 }
   0xc   :  { %p945_p3 = scmp.ne.s32.totalorder %s32_s22, %s944_s8  ;;  %p950_p5 = scmp.lt.s32.totalorder %s944_s8, %s944_s8 }
   0xe   :  { %p951_p6 = por %p950_p5, %p949_p4 }
  0x10   :  { %p952_p7 = pnand %p951_p6, %p945_p3 }
  0x12   :  { %955 = shalt.err (!%p952_p7)
}
  0x13   :  { %34 = dma.hbm_to_vmem [thread:$0]  %s1170_s1, 64, %s32_s22, [#allocation6]  }
  0x14   :  { %s956_s13 = scalar_lea.hbm %s1169_s0, 64 }
  0x15   :  { %p957_p8 = scmp.ne.s32.totalorder %s1169_s0, %s956_s13  ;;  %p960_p9 = scmp.lt.u32.totalorder %s956_s13, %s1169_s0 }
  0x17   :  { %p962_p10 = pnand %p960_p9, %p957_p8 }
  0x19   :  { %965 = shalt.err (!%p962_p10)
}
  0x1a   :  { %s966_s18 = scalar_lea.vmem %s22_s24, 64  ;;  %p971_p12 = scmp.lt.s32.totalorder %s22_s24, %s22_s24 }
  0x1b   :  { %p967_p11 = scmp.ne.s32.totalorder %s22_s24, %s966_s18  ;;  %p972_p13 = scmp.lt.s32.totalorder %s966_s18, %s966_s18 }
  0x1d   :  { %p973_p0 = por %p972_p13, %p971_p12 }
  0x1f   :  { %p974_p1 = pnand %p973_p0, %p967_p11 }
  0x21   :  { %977 = shalt.err (!%p974_p1)
}
  0x22   :  { %24 = dma.hbm_to_vmem [thread:$0]  %s1169_s0, 64, %s22_s24, [#allocation3]  }
  0x23   :  { %s1054_s20 = smov [#allocation7]   ;;  %s978_s25 = scalar_lea.hbm %s1171_s2, 384 }
  0x24   :  { %s40_s21 = sshll.u32 %s1054_s20, 4  ;;  %p979_p2 = scmp.ne.s32.totalorder %s1171_s2, %s978_s25  ;;  %s41_s21 = int_to_ptr.vmem [resolvable:$true] %s40_s21 }
  0x25   :  { %p982_p3 = scmp.lt.u32.totalorder %s978_s25, %s1171_s2 }
  0x27   :  { %p984_p4 = pnand %p982_p3, %p979_p2 }
  0x29   :  { %987 = shalt.err (!%p984_p4)
}
  0x2a   :  { %s988_s30 = scalar_lea.vmem %s41_s21, 384  ;;  %p993_p6 = scmp.lt.s32.totalorder %s41_s21, %s41_s21 }
  0x2b   :  { %p989_p5 = scmp.ne.s32.totalorder %s41_s21, %s988_s30  ;;  %p994_p7 = scmp.lt.s32.totalorder %s988_s30, %s988_s30 }
  0x2d   :  { %p995_p8 = por %p994_p7, %p993_p6 }
  0x2f   :  { %p996_p9 = pnand %p995_p8, %p989_p5 }
  0x31   :  { %999 = shalt.err (!%p996_p9)
}
  0x32   :  { %s1055_s0 = smov 128   ;;  %s1056_s24 = smov 8  }
  0x33   :  { %46 = dma.hbm_to_vmem [thread:$0]  %s1171_s2, 384, %s41_s21, [#allocation6], %s1055_s0, %s1055_s0, %s1056_s24  }
  0x34   :  { %s1057_s9 = smov [#allocation8]   ;;  %s1000_s13 = scalar_lea.hbm %s1173_s4, 8192 }
  0x35   :  { %s54_s10 = sshll.u32 %s1057_s9, 4  ;;  %p1001_p10 = scmp.ne.s32.totalorder %s1173_s4, %s1000_s13  ;;  %s55_s10 = int_to_ptr.vmem [resolvable:$true] %s54_s10 }
  0x36   :  { %p1004_p11 = scmp.lt.u32.totalorder %s1000_s13, %s1173_s4 }
  0x38   :  { %p1006_p12 = pnand %p1004_p11, %p1001_p10 }
  0x3a   :  { %1009 = shalt.err (!%p1006_p12)
}
  0x3b   :  { %s1010_s18 = scalar_lea.vmem %s55_s10, 8192  ;;  %p1015_p0 = scmp.lt.s32.totalorder %s55_s10, %s55_s10 }
  0x3c   :  { %p1011_p13 = scmp.ne.s32.totalorder %s55_s10, %s1010_s18  ;;  %p1016_p1 = scmp.lt.s32.totalorder %s1010_s18, %s1010_s18 }
  0x3e   :  { %p1017_p2 = por %p1016_p1, %p1015_p0 }
  0x40   :  { %p1018_p3 = pnand %p1017_p2, %p1011_p13 }
  0x42   :  { %1021 = shalt.err (!%p1018_p3)
}
  0x43   :  { %s1058_s2 = smov 256   ;;  %s1059_s1 = smov 16  }
  0x44   :  { %60 = dma.hbm_to_vmem [thread:$0]  %s1173_s4, 8192, %s55_s10, [#allocation9], %s1058_s2, %s1058_s2, %s1059_s1  }
  0x45   :  { %1044 = dma.done.wait [#allocation3], 64  }
  0x46   :  { %1045 = vsyncadd [#allocation3], 4294967232 }
  0x47   :  { %1046 = dma.done.wait [#allocation6], 448  }
  0x48   :  { %1047 = vsyncadd [#allocation6], 4294966848 }
  0x49   :  { %1048 = dma.done.wait [#allocation9], 8192  }
  0x4a   :  { %1049 = vsyncadd [#allocation9], 4294959104  ;;  %v1060_v0 = vmov 0   ;;  %vm229_vm0 = vcmask 1040384   ;;  %v831_v1 = vld [vmem:[#allocation7 + $0x4] ss:$8 sps:$4 sm:$0xff]  }
  0x4b   :  { %201 = vmatprep.mubr.bf16.mxu0 %v1060_v0  ;;  %270 = vmatprep.mubr.bf16.mxu1 %v1060_v0  ;;  %vm162_vm1 = vcmask 1042432   ;;  %v231_v2 = vsel %vm229_vm0, 65535, %v1060_v0  ;;  %v152_v3 = vld [vmem:[%s1172_s3] sm:$0x77]  ;;  %v151_v5 = vld [vmem:[#allocation7 + $0x10] sm:$0x11] }
  0x4c   :  { %v834_v4 = vld [vmem:[#allocation7] ss:$8 sps:$4 sm:$0xff]   ;;  %238 = vmatprep.subr.bf16.mxu1 %v831_v1  ;;  %v749_v6 = vcombine.high %v152_v3, %v152_v3  ;;  %v748_v7 = vcombine.low %v152_v3, %v152_v3  ;;  %v755_v8 = vcombine.high %v151_v5, %v151_v5  ;;  %v78_v9 = vld [vmem:[#allocation5] sm:$0xf]  ;;  %v754_v10 = vcombine.low %v151_v5, %v151_v5  ;;  %v76_v11 = vld [vmem:[#allocation2] sm:$0xf] }
  0x4d   :  { %239 = vmatpush1.bf16.msra.mxu1 %v834_v4  ;;  %v840_v12 = vld [vmem:[#allocation8 + $0x4] ss:$16 sps:$4 sm:$0xff]   ;;  %v79_v15 = vpack.c.bf16 %v78_v9, %v78_v9  ;;  %vm158_vm2 = vcmask 48128   ;;  %v838_v17 = vld [vmem:[#allocation8] ss:$16 sps:$4 sm:$0xff]   ;;  %v77_v18 = vpack.c.bf16 %v76_v11, %v76_v11  ;;  %vm225_vm3 = vcmask 138240  }
  0x4e   :  { %750 = vmatprep.subr.msk.bf16.mxu0 %vm162_vm1, %v749_v6  ;;  %v164_v13 = vsel %vm162_vm1, %v748_v7, 0  ;;  %v236_v14 = vand.u32 %v755_v8, %v231_v2  ;;  %v233_v16 = vand.u32 %v754_v10, %v231_v2  ;;  %v843_v19 = vld [vmem:[#allocation8 + $0x24] ss:$16 sps:$4 sm:$0xff]   ;;  %v841_v20 = vld [vmem:[#allocation8 + $0x20] ss:$16 sps:$4 sm:$0xff]   ;;  %s1061_s28 = smov [#allocation10]  }
  0x4f   :  { %170 = vmatpush1.bf16.msra.mxu0 %v164_v13  ;;  %v846_v21 = vld [vmem:[#allocation8 + $0x44] ss:$16 sps:$4 sm:$0xff]   ;;  %v844_v22 = vld [vmem:[#allocation8 + $0x40] ss:$16 sps:$4 sm:$0xff]   ;;  %v886_v49 = vld [vmem:[#allocation8 + $0x8] ss:$16 sps:$4 sm:$0xff]   ;;  %v280_v13 = vlaneseq }
  0x50   :  { %240 = vmatprep.subr.bf16.mxu1 %v236_v14  ;;  %467 = vmatprep.subr.bf16.mxu0 %v840_v12  ;;  %v849_v23 = vld [vmem:[#allocation8 + $0x64] ss:$16 sps:$4 sm:$0xff]   ;;  %v847_v24 = vld [vmem:[#allocation8 + $0x60] ss:$16 sps:$4 sm:$0xff]   ;;  %v888_v50 = vld [vmem:[#allocation8 + $0xc] ss:$16 sps:$4 sm:$0xff]  }
  0x51   :  { %241 = vmatpush1.bf16.msra.mxu1 %v233_v16  ;;  %v852_v25 = vld [vmem:[#allocation8 + $0x84] ss:$16 sps:$4 sm:$0xff]   ;;  %v850_v26 = vld [vmem:[#allocation8 + $0x80] ss:$16 sps:$4 sm:$0xff]   ;;  %v891_v51 = vld [vmem:[#allocation8 + $0x2c] ss:$16 sps:$4 sm:$0xff]  }
  0x52   :  { %751 = vmatmul.mubr.msk.bf16.vlgmr.msra.gmra.mrb[0].mxu0 %vm158_vm2, %v79_v15  ;;  %v855_v27 = vld [vmem:[#allocation8 + $0xa4] ss:$16 sps:$4 sm:$0xff]   ;;  %v853_v28 = vld [vmem:[#allocation8 + $0xa0] ss:$16 sps:$4 sm:$0xff]   ;;  %683 = vmatprep.subr.bf16.mxu1 %v888_v50  ;;  %v889_v52 = vld [vmem:[#allocation8 + $0x28] ss:$16 sps:$4 sm:$0xff]  }
  0x53   :  { %468 = vmatpush1.bf16.msra.mxu0 %v838_v17  ;;  %v858_v29 = vld [vmem:[#allocation8 + $0xc4] ss:$16 sps:$4 sm:$0xff]   ;;  %v856_v30 = vld [vmem:[#allocation8 + $0xc0] ss:$16 sps:$4 sm:$0xff]   ;;  %v894_v53 = vld [vmem:[#allocation8 + $0x4c] ss:$16 sps:$4 sm:$0xff]  }
  0x54   :  { %756 = vmatmul.mubr.msk.bf16.vlgmr.msra.gmra.mrb[0].mxu1 %vm225_vm3, %v77_v18  ;;  %469 = vmatprep.subr.bf16.mxu0 %v843_v19  ;;  %v861_v31 = vld [vmem:[#allocation8 + $0xe4] ss:$16 sps:$4 sm:$0xff]   ;;  %v859_v32 = vld [vmem:[#allocation8 + $0xe0] ss:$16 sps:$4 sm:$0xff]   ;;  %v892_v54 = vld [vmem:[#allocation8 + $0x48] ss:$16 sps:$4 sm:$0xff]  }
  0x55   :  { %v864_v33 = vld [vmem:[#allocation8 + $0x104] ss:$16 sps:$4 sm:$0xff]   ;;  %v862_v34 = vld [vmem:[#allocation8 + $0x100] ss:$16 sps:$4 sm:$0xff]   ;;  %684 = vmatpush1.bf16.msra.mxu1 %v886_v49  ;;  %v897_v55 = vld [vmem:[#allocation8 + $0x6c] ss:$16 sps:$4 sm:$0xff]  }
  0x56   :  { %v867_v35 = vld [vmem:[#allocation8 + $0x124] ss:$16 sps:$4 sm:$0xff]   ;;  %v865_v36 = vld [vmem:[#allocation8 + $0x120] ss:$16 sps:$4 sm:$0xff]   ;;  %685 = vmatprep.subr.bf16.mxu1 %v891_v51  ;;  %v895_v56 = vld [vmem:[#allocation8 + $0x68] ss:$16 sps:$4 sm:$0xff]  }
  0x57   :  { %470 = vmatpush1.bf16.msra.mxu0 %v841_v20  ;;  %v870_v37 = vld [vmem:[#allocation8 + $0x144] ss:$16 sps:$4 sm:$0xff]   ;;  %v868_v38 = vld [vmem:[#allocation8 + $0x140] ss:$16 sps:$4 sm:$0xff]   ;;  %v900_v57 = vld [vmem:[#allocation8 + $0x8c] ss:$16 sps:$4 sm:$0xff]  }
  0x58   :  { %471 = vmatprep.subr.bf16.mxu0 %v846_v21  ;;  %v873_v39 = vld [vmem:[#allocation8 + $0x164] ss:$16 sps:$4 sm:$0xff]   ;;  %v871_v40 = vld [vmem:[#allocation8 + $0x160] ss:$16 sps:$4 sm:$0xff]   ;;  %v898_v58 = vld [vmem:[#allocation8 + $0x88] ss:$16 sps:$4 sm:$0xff]  }
  0x59   :  { %v876_v41 = vld [vmem:[#allocation8 + $0x184] ss:$16 sps:$4 sm:$0xff]   ;;  %v874_v42 = vld [vmem:[#allocation8 + $0x180] ss:$16 sps:$4 sm:$0xff]   ;;  %686 = vmatpush1.bf16.msra.mxu1 %v889_v52  ;;  %v903_v59 = vld [vmem:[#allocation8 + $0xac] ss:$16 sps:$4 sm:$0xff]  }
  0x5a   :  { %v879_v43 = vld [vmem:[#allocation8 + $0x1a4] ss:$16 sps:$4 sm:$0xff]   ;;  %v877_v44 = vld [vmem:[#allocation8 + $0x1a0] ss:$16 sps:$4 sm:$0xff]   ;;  %687 = vmatprep.subr.bf16.mxu1 %v894_v53  ;;  %v901_v60 = vld [vmem:[#allocation8 + $0xa8] ss:$16 sps:$4 sm:$0xff]  }
  0x5b   :  { %472 = vmatpush1.bf16.msra.mxu0 %v844_v22  ;;  %v882_v45 = vld [vmem:[#allocation8 + $0x1c4] ss:$16 sps:$4 sm:$0xff]   ;;  %v880_v46 = vld [vmem:[#allocation8 + $0x1c0] ss:$16 sps:$4 sm:$0xff]   ;;  %v906_v61 = vld [vmem:[#allocation8 + $0xcc] ss:$16 sps:$4 sm:$0xff]  }
  0x5c   :  { %473 = vmatprep.subr.bf16.mxu0 %v849_v23  ;;  %v885_v47 = vld [vmem:[#allocation8 + $0x1e4] ss:$16 sps:$4 sm:$0xff]   ;;  %v883_v48 = vld [vmem:[#allocation8 + $0x1e0] ss:$16 sps:$4 sm:$0xff]   ;;  %v904_v62 = vld [vmem:[#allocation8 + $0xc8] ss:$16 sps:$4 sm:$0xff]  }
  0x5d   :  { %688 = vmatpush1.bf16.msra.mxu1 %v892_v54  ;;  %v909_v63 = vld [vmem:[#allocation8 + $0xec] ss:$16 sps:$4 sm:$0xff]   ;;  %v907_v0 = vld [vmem:[#allocation8 + $0xe8] ss:$16 sps:$4 sm:$0xff]   ;;  %v281_v14 = vshrl.u32 %v280_v13, 7  ;;  %s735_s29 = sshll.u32 %s1061_s28, 4  ;;  %s736_s29 = int_to_ptr.vmem [resolvable:$true] %s735_s29 }
  0x5e   :  { %689 = vmatprep.subr.bf16.mxu1 %v897_v55  ;;  %v912_v1 = vld [vmem:[#allocation8 + $0x10c] ss:$16 sps:$4 sm:$0xff]   ;;  %v910_v2 = vld [vmem:[#allocation8 + $0x108] ss:$16 sps:$4 sm:$0xff]   ;;  %s1022_s30 = scalar_lea.vmem %s736_s29, 128  ;;  %p1027_p5 = scmp.lt.s32.totalorder %s736_s29, %s736_s29 }
  0x5f   :  { %474 = vmatpush1.bf16.msra.mxu0 %v847_v24  ;;  %v915_v3 = vld [vmem:[#allocation8 + $0x12c] ss:$16 sps:$4 sm:$0xff]   ;;  %v913_v4 = vld [vmem:[#allocation8 + $0x128] ss:$16 sps:$4 sm:$0xff]   ;;  %v282_v15 = vsub.s32 0, %v281_v14  ;;  %v286_v17 = vsub.s32 1, %v281_v14  ;;  %p1023_p4 = scmp.ne.s32.totalorder %s736_s29, %s1022_s30  ;;  %p1028_p6 = scmp.lt.s32.totalorder %s1022_s30, %s1022_s30 }
  0x60   :  { %475 = vmatprep.subr.bf16.mxu0 %v852_v25  ;;  %v918_v5 = vld [vmem:[#allocation8 + $0x14c] ss:$16 sps:$4 sm:$0xff]   ;;  %v916_v6 = vld [vmem:[#allocation8 + $0x148] ss:$16 sps:$4 sm:$0xff]  }
  0x61   :  { %690 = vmatpush1.bf16.msra.mxu1 %v895_v56  ;;  %v921_v7 = vld [vmem:[#allocation8 + $0x16c] ss:$16 sps:$4 sm:$0xff]   ;;  %v919_v8 = vld [vmem:[#allocation8 + $0x168] ss:$16 sps:$4 sm:$0xff]   ;;  %p1029_p7 = por %p1028_p6, %p1027_p5 }
  0x62   :  { %691 = vmatprep.subr.bf16.mxu1 %v900_v57  ;;  %v924_v9 = vld [vmem:[#allocation8 + $0x18c] ss:$16 sps:$4 sm:$0xff]   ;;  %v922_v10 = vld [vmem:[#allocation8 + $0x188] ss:$16 sps:$4 sm:$0xff]  }
  0x63   :  { %476 = vmatpush1.bf16.msra.mxu0 %v850_v26  ;;  %v927_v11 = vld [vmem:[#allocation8 + $0x1ac] ss:$16 sps:$4 sm:$0xff]   ;;  %v925_v12 = vld [vmem:[#allocation8 + $0x1a8] ss:$16 sps:$4 sm:$0xff]   ;;  %p1030_p8 = pnand %p1029_p7, %p1023_p4 }
  0x64   :  { %477 = vmatprep.subr.bf16.mxu0 %v855_v27  ;;  %v144_v16 = vld [vmem:[%s1174_s5] ss:$4 sm:$0x3]  ;;  %v747_v53 = vld [vmem:[%s1174_s5 + $0x2] ss:$4 sm:$0x3] }
  0x65   :  { %692 = vmatpush1.bf16.msra.mxu1 %v898_v58  ;;  %v283_v20 = vrot.slane %v144_v16, %v282_v15  ;;  %v287_v23 = vrot.slane %v144_v16, %v286_v17  ;;  %v516_v54 = vrot.slane %v747_v53, %v282_v15  ;;  %v520_v55 = vrot.slane %v747_v53, %v286_v17 }
  0x66   :  { %693 = vmatprep.subr.bf16.mxu1 %v903_v59 }
  0x67   :  { %478 = vmatpush1.bf16.msra.mxu0 %v853_v28 }
  0x68   :  { %479 = vmatprep.subr.bf16.mxu0 %v858_v29 }
  0x69   :  { %694 = vmatpush1.bf16.msra.mxu1 %v901_v60 }
  0x6a   :  { %695 = vmatprep.subr.bf16.mxu1 %v906_v61 }
  0x6b   :  { %480 = vmatpush1.bf16.msra.mxu0 %v856_v30 }
  0x6c   :  { %481 = vmatprep.subr.bf16.mxu0 %v861_v31 }
  0x6d   :  { %696 = vmatpush1.bf16.msra.mxu1 %v904_v62 }
  0x6e   :  { %697 = vmatprep.subr.bf16.mxu1 %v909_v63 }
  0x6f   :  { %482 = vmatpush1.bf16.msra.mxu0 %v859_v32 }
  0x70   :  { %483 = vmatprep.subr.bf16.mxu0 %v864_v33 }
  0x71   :  { %698 = vmatpush1.bf16.msra.mxu1 %v907_v0 }
  0x72   :  { %699 = vmatprep.subr.bf16.mxu1 %v912_v1 }
  0x73   :  { %484 = vmatpush1.bf16.msra.mxu0 %v862_v34 }
  0x74   :  { %485 = vmatprep.subr.bf16.mxu0 %v867_v35 }
  0x75   :  { %700 = vmatpush1.bf16.msra.mxu1 %v910_v2 }
  0x76   :  { %701 = vmatprep.subr.bf16.mxu1 %v915_v3 }
  0x77   :  { %486 = vmatpush1.bf16.msra.mxu0 %v865_v36  ;;  %v930_v36 = vld [vmem:[#allocation8 + $0x1cc] ss:$16 sps:$4 sm:$0xff]  }
  0x78   :  { %487 = vmatprep.subr.bf16.mxu0 %v870_v37  ;;  %v928_v37 = vld [vmem:[#allocation8 + $0x1c8] ss:$16 sps:$4 sm:$0xff]  }
  0x79   :  { %702 = vmatpush1.bf16.msra.mxu1 %v913_v4 }
  0x7a   :  { %703 = vmatprep.subr.bf16.mxu1 %v918_v5 }
  0x7b   :  { %488 = vmatpush1.bf16.msra.mxu0 %v868_v38  ;;  %v933_v38 = vld [vmem:[#allocation8 + $0x1ec] ss:$16 sps:$4 sm:$0xff]  }
  0x7c   :  { %489 = vmatprep.subr.bf16.mxu0 %v873_v39  ;;  %v931_v39 = vld [vmem:[#allocation8 + $0x1e8] ss:$16 sps:$4 sm:$0xff]  }
  0x7d   :  { %704 = vmatpush1.bf16.msra.mxu1 %v916_v6 }
  0x7e   :  { %705 = vmatprep.subr.bf16.mxu1 %v921_v7 }
  0x7f   :  { %490 = vmatpush1.bf16.msra.mxu0 %v871_v40  ;;  %v746_v40 = vld [vmem:[%s1174_s5 + $0x1] ss:$4 sm:$0x3] }
  0x80   :  { %491 = vmatprep.subr.bf16.mxu0 %v876_v41  ;;  %v300_v41 = vrot.slane %v746_v40, %v282_v15 }
  0x81   :  { %706 = vmatpush1.bf16.msra.mxu1 %v919_v8 }
  0x82   :  { %707 = vmatprep.subr.bf16.mxu1 %v924_v9 }
  0x83   :  { %492 = vmatpush1.bf16.msra.mxu0 %v874_v42  ;;  %v304_v42 = vrot.slane %v746_v40, %v286_v17 }
  0x84   :  { %493 = vmatprep.subr.bf16.mxu0 %v879_v43 }
  0x85   :  { %708 = vmatpush1.bf16.msra.mxu1 %v922_v10 }
  0x86   :  { %709 = vmatprep.subr.bf16.mxu1 %v927_v11 }
  0x87   :  { %494 = vmatpush1.bf16.msra.mxu0 %v877_v44 }
  0x88   :  { %495 = vmatprep.subr.bf16.mxu0 %v882_v45 }
  0x89   :  { %710 = vmatpush1.bf16.msra.mxu1 %v925_v12 }
  0x8a   :  { %711 = vmatprep.subr.bf16.mxu1 %v930_v36 }
  0x8b   :  { %496 = vmatpush1.bf16.msra.mxu0 %v880_v46 }
  0x8c   :  { %497 = vmatprep.subr.bf16.mxu0 %v885_v47 }
  0x8d   :  { %712 = vmatpush1.bf16.msra.mxu1 %v928_v37 }
  0x8e   :  { %713 = vmatprep.subr.bf16.mxu1 %v933_v38 }
  0x8f   :  { %498 = vmatpush1.bf16.msra.mxu0 %v883_v48 }
  0x91   :  { %714 = vmatpush1.bf16.msra.mxu1 %v931_v39 }
 0x125   :  { %v203_v18 = vpop.f32.mrb[0].mxu0 }
 0x126   :  { %v205_v19 = vpop.f32.mrb[1].mxu0 }
 0x127   :  { %v207_v21 = vpop.f32.mrb[2].mxu0  ;;  %v272_v22 = vpop.f32.mrb[0].mxu1 }
 0x128   :  { %v208_v24 = vpop.f32.mrb[3].mxu0  ;;  %v273_v25 = vadd.f32 %v272_v22, %v203_v18  ;;  %v274_v26 = vpop.f32.mrb[1].mxu1 }
 0x129   :  { %v275_v27 = vadd.f32 %v274_v26, %v205_v19  ;;  %v276_v28 = vpop.f32.mrb[2].mxu1 }
 0x12a   :  { %v290_v29 = vadd.f32 %v283_v20, %v273_v25  ;;  %v277_v30 = vpop.f32.mrb[3].mxu1 }
 0x12b   :  { %v291_v31 = vadd.f32 %v287_v23, %v275_v27 }
 0x12c   :  { %v292_v32 = vmax.f32 %v290_v29, 0.0 }
 0x12d   :  { %v293_v33 = vmax.f32 %v291_v31, 0.0 }
 0x12e   :  { %v294_v35 = vpack.c.bf16 %v292_v32, %v292_v32 }
 0x12f   :  { %v295_v34 = vpack.c.bf16 %v293_v33, %v293_v33 }
 0x131   :  { %499 = vmatprep.mubr.bf16.mxu0 %v295_v34 }
 0x132   :  { %500 = vmatmul.mubr.bf16.vlgmr.msra.gmra.mrb[4].mxu0 %v294_v35 }
 0x205   :  { %v501_v43 = vpop.f32.mrb[4].mxu0 }
 0x206   :  { %v502_v44 = vadd.f32 %v501_v43, %v300_v41  ;;  %v503_v45 = vpop.f32.mrb[5].mxu0 }
 0x207   :  { %v504_v46 = vadd.f32 %v503_v45, %v304_v42  ;;  %v505_v47 = vpop.f32.mrb[6].mxu0 }
 0x208   :  { %v508_v48 = vmax.f32 %v502_v44, 0.0  ;;  %v506_v49 = vpop.f32.mrb[7].mxu0 }
 0x209   :  { %v509_v50 = vmax.f32 %v504_v46, 0.0 }
 0x20a   :  { %v510_v52 = vpack.c.bf16 %v508_v48, %v508_v48 }
 0x20b   :  { %v511_v51 = vpack.c.bf16 %v509_v50, %v509_v50 }
 0x20d   :  { %715 = vmatprep.mubr.bf16.mxu1 %v511_v51 }
 0x20e   :  { %716 = vmatmul.mubr.bf16.vlgmr.msra.gmra.mrb[4].mxu1 %v510_v52 }
 0x2e1   :  { %v717_v56 = vpop.f32.mrb[4].mxu1 }
 0x2e2   :  { %v718_v57 = vadd.f32 %v717_v56, %v516_v54  ;;  %v719_v58 = vpop.f32.mrb[5].mxu1 }
 0x2e3   :  { %v720_v59 = vadd.f32 %v719_v58, %v520_v55  ;;  %v721_v60 = vpop.f32.mrb[6].mxu1 }
 0x2e4   :  { %v722_v61 = vpop.f32.mrb[7].mxu1 }
 0x2e5   :  { %v726_v62 = vcombine.low %v718_v57, %v720_v59 }
 0x2e7   :  { %728 = vst [vmem:[#allocation10] sm:$0xff] %v726_v62 }
 0x2e8   :  { %1033 = shalt.err (!%p1030_p8)
}
 0x2e9   :  { %s1034_s24 = scalar_lea.hbm %s1175_s6, 128 }
 0x2ea   :  { %p1035_p9 = scmp.ne.s32.totalorder %s1175_s6, %s1034_s24  ;;  %p1038_p10 = scmp.lt.u32.totalorder %s1034_s24, %s1175_s6 }
 0x2ec   :  { %p1040_p11 = pnand %p1038_p10, %p1035_p9 }
 0x2ee   :  { %1043 = shalt.err (!%p1040_p11)
}
 0x2ef   :  { %738 = dma.vmem_to_hbm [thread:$0]  %s736_s29, 128, %s1175_s6, [#allocation4]  }
 0x2f0   :  { %1050 = dma.done.wait [#allocation4], 128  }
 0x2f1   :  { %1051 = vsyncadd [#allocation4], 4294967168 }
 0x2f2   :  { %742 = vsyncpa [#allocation3], 1 }
 0x2f3   :  { %743 = vsyncpa [#allocation6], 1 }
 0x2f4   :  { %744 = vsyncpa [#allocation9], 1 }
 0x2f5   :  { %745 = vsyncpa [#allocation4], 1 }

</bundles_post_ra>
